<compile_context>
chip_gen: v7x
topology: tpu7x:2x2x1
jax: 0.10.0
libtpu: 0.0.40
codegen_flags: <defaults>
</compile_context>

<pallas_src>
import math

import jax
import jax.numpy as jnp
from jax.experimental import pallas as pl
from jax.experimental.pallas import tpu as pltpu


def build_pe_table(d_model: int, max_len: int = 5000) -> jnp.ndarray:
    """Deterministic (max_len, 1, d_model) f32 buffer, identical to the torch __init__.
    Build it ONCE at module setup — never inside the per-call forward path."""
    position = jnp.arange(0, max_len, dtype=jnp.float32)[:, None]            # (L, 1)
    div_term = jnp.exp(
        jnp.arange(0, d_model, 2, dtype=jnp.float32) * (-math.log(10000.0) / d_model)
    )                                                                         # (D/2,)
    pe = jnp.zeros((max_len, d_model), dtype=jnp.float32)
    pe = pe.at[:, 0::2].set(jnp.sin(position * div_term))
    pe = pe.at[:, 1::2].set(jnp.cos(position * div_term))
    return pe[:, None, :]                                                     # (L, 1, D)


def _pe_add_kernel(x_ref, pe_ref, o_ref):
    # x_ref: (TS, B, D); pe_ref: (TS, D).  f32 math (matches torch promotion for bf16 x),
    # cast on store; the (TS,1,D)->(TS,B,D) sublane broadcast is free VPU work under DMA.
    x = x_ref[...].astype(jnp.float32)
    pe = pe_ref[...].astype(jnp.float32)[:, None, :]
    o_ref[...] = (x + pe).astype(o_ref.dtype)
    # TODO(synk): train-mode dropout would need in-kernel PRNG (pltpu.prng_seed /
    # pltpu.prng_random_bits); eval-mode dropout is the identity reproduced here.


def _pick_seq_tile(s, b, d, x_itemsize, pe_itemsize, max_len,
                   vmem_budget_bytes=36 * 1024 * 1024):
    """Seq tile such that double-buffered x + out + pe blocks fit ~36 MiB
    (headroom under the 48 MiB scoped limit on all generations, incl. v7x's
    64 MiB physical VMEM per TC).  Capped at ceil(S/2) so the grid keeps >= 2
    steps for v7x megacore (when S >= 16); multiple of 8 because the 2-D pe
    block's second-to-last dim (ts) must obey the (8, 128) tiling rule."""
    row_bytes = 2 * (2 * b * d * x_itemsize + d * pe_itemsize)   # x + out + pe, double-buffered
    ts = max(1, vmem_budget_bytes // row_bytes)
    ts = min(ts, max(1, pl.cdiv(s, 2)))        # keep >= 2 grid steps when possible
    ts = max(8, (ts // 8) * 8)                 # sublane alignment for the 2-D pe block
    # Never let a pe block run past the end of the table (only possible when s is
    # within ts of max_len and not ts-aligned); ts=8 is always in-bounds for the
    # standard max_len=5000 buffer.
    if pl.cdiv(s, ts) * ts > max_len:
        ts = 8
    return ts


def positional_encoding_forward(x: jnp.ndarray, pe_table: jnp.ndarray) -> jnp.ndarray:
    """x: (seq_len, batch, d_model) -> same shape/dtype.
    pe_table: full (max_len, 1, d_model) or (max_len, d_model) buffer (any float dtype);
    only the first seq_len rows are read, via BlockSpec addressing (no wrapper slice)."""
    s, b, d = x.shape
    max_len = pe_table.shape[0]
    if s > max_len:
        raise ValueError(f"seq_len={s} exceeds pe_table max_len={max_len}")

    # Metadata-only squeeze of the singleton batch dim -> dense 2-D pe operand.
    pe2d = pe_table.reshape(max_len, pe_table.shape[-1])
    if pe2d.shape[-1] != d:
        raise ValueError("d_model mismatch between x and pe_table")

    ts = _pick_seq_tile(s, b, d, x.dtype.itemsize, pe2d.dtype.itemsize, max_len)
    grid = (pl.cdiv(s, ts),)

    return pl.pallas_call(
        _pe_add_kernel,
        out_shape=jax.ShapeDtypeStruct((s, b, d), x.dtype),
        grid=grid,
        in_specs=[
            pl.BlockSpec((ts, b, d), lambda i: (i, 0, 0)),   # x tile, full (B, D) lane-dense
            pl.BlockSpec((ts, d), lambda i: (i, 0)),         # first-S rows of pe via DMA addressing
        ],
        out_specs=pl.BlockSpec((ts, b, d), lambda i: (i, 0, 0)),
        input_output_aliases={0: 0},   # out may reuse x's HBM buffer when x is dead
        compiler_params=pltpu.CompilerParams(
            dimension_semantics=("parallel",),     # seq tiles shardable across v7x TCs
            vmem_limit_bytes=48 * 1024 * 1024,
        ),
    )(x, pe2d)


if __name__ == "__main__":
    seq_len, batch, d_model = 8, 2, 32

    key = jax.random.PRNGKey(0)
    x = jax.random.normal(key, (seq_len, batch, d_model), dtype=jnp.float32)
    pe_table = build_pe_table(d_model, max_len=5000)   # built once, f32

    # Pure-JAX reference of the same eval-mode forward.  Computed before the kernel
    # call since the kernel may alias x's buffer via input_output_aliases.
    ref = x + pe_table[:seq_len]
    x_shape, x_dtype = x.shape, x.dtype

    fwd = jax.jit(positional_encoding_forward)
    out = jax.block_until_ready(fwd(x, pe_table))

    assert out.shape == x_shape and out.dtype == x_dtype
    assert jnp.allclose(out, ref, atol=1e-6), "mismatch vs reference"
    print("KERNEL_OK")
</pallas_src>

<mosaic_0001>
module attributes {stable_mosaic.version = 11 : i64} {
  func.func @_pe_add_kernel(%arg0: i32, %arg1: memref<8x2x32xf32, #tpu.memory_space<vmem>>, %arg2: memref<8x32xf32, #tpu.memory_space<vmem>>, %arg3: memref<8x2x32xf32, #tpu.memory_space<vmem>>) attributes {dimension_semantics = [#tpu.dimension_semantics<parallel>], iteration_bounds = array<i64: 1>, scalar_prefetch = 0 : i64, scratch_operands = 0 : i64, tpu.core_type = #tpu.core_type<tc>, window_params = [{transform_indices = @transform_0, window_bounds = array<i64: 8, 2, 32>}, {transform_indices = @transform_1, window_bounds = array<i64: 8, 32>}, {transform_indices = @transform_2, window_bounds = array<i64: 8, 2, 32>}]} {
    %c0 = arith.constant 0 : index
    %c0_0 = arith.constant 0 : index
    %c0_1 = arith.constant 0 : index
    %0 = vector.load %arg1[%c0, %c0_0, %c0_1] : memref<8x2x32xf32, #tpu.memory_space<vmem>>, vector<8x2x32xf32>
    %c0_2 = arith.constant 0 : index
    %c0_3 = arith.constant 0 : index
    %1 = vector.load %arg2[%c0_2, %c0_3] : memref<8x32xf32, #tpu.memory_space<vmem>>, vector<8x32xf32>
    %2 = vector.shape_cast %1 : vector<8x32xf32> to vector<8x1x32xf32>
    %3 = vector.broadcast %2 : vector<8x1x32xf32> to vector<8x2x32xf32>
    %4 = arith.addf %0, %3 : vector<8x2x32xf32>
    %c0_4 = arith.constant 0 : index
    %c0_5 = arith.constant 0 : index
    %c0_6 = arith.constant 0 : index
    %5 = vector.load %arg3[%c0_4, %c0_5, %c0_6] : memref<8x2x32xf32, #tpu.memory_space<vmem>>, vector<8x2x32xf32>
    tpu.vector_store %arg3[%c0_4, %c0_5, %c0_6], %4 {strides = array<i32>} : memref<8x2x32xf32, #tpu.memory_space<vmem>>, vector<8x2x32xf32>,
    return
  }
  func.func @transform_0(%arg0: i32) -> (i32, i32, i32) {
    %c0_i32 = arith.constant 0 : i32
    %c0_i32_0 = arith.constant 0 : i32
    %c0_i32_1 = arith.constant 0 : i32
    return %arg0, %c0_i32, %c0_i32_0 : i32, i32, i32
  }
  func.func @transform_1(%arg0: i32) -> (i32, i32) {
    %c0_i32 = arith.constant 0 : i32
    %c0_i32_0 = arith.constant 0 : i32
    return %arg0, %c0_i32 : i32, i32
  }
  func.func @transform_2(%arg0: i32) -> (i32, i32, i32) {
    %c0_i32 = arith.constant 0 : i32
    %c0_i32_0 = arith.constant 0 : i32
    %c0_i32_1 = arith.constant 0 : i32
    return %arg0, %c0_i32, %c0_i32_0 : i32, i32, i32
  }
}

</mosaic_0001>

<bundles_post_ra>
// kernel: positional_encoding_forward.1
= control target key start
LH: loop header
LB: loop body
LE: loop exit
PB: predicated region body
PF: predicated region fallthrough
CT: control target
= control target key end

     0   :  { %7 = vsyncpa [#allocation3], 0  ;;  %s273_s0 = inlined_call_operand.hbm [shape: f32[8,2,32], index: 0, kind: input, shape index: {}, may-alias: {0,2}]   ;;  %s274_s1 = inlined_call_operand.vmem [shape: f32[5000,32], index: 1, kind: input, shape index: {}]   ;;  %s275_s2 = inlined_call_operand.hbm [shape: f32[8,2,32], index: 2, kind: output, shape index: {}, may-alias: {0,2}]  }
   0x1   :  { %8 = vsyncpa [#allocation4], 0  ;;  %s212_s9 = smov [#allocation2]   ;;  %s164_s13 = scalar_lea.hbm %s273_s0, 256 }
   0x2   :  { %s14_s10 = sshll.u32 %s212_s9, 4  ;;  %p165_p0 = scmp.ne.s32.totalorder %s273_s0, %s164_s13  ;;  %s15_s10 = int_to_ptr.vmem [resolvable:$true] %s14_s10 }
   0x3   :  { %p168_p1 = scmp.lt.u32.totalorder %s164_s13, %s273_s0 }
   0x5   :  { %p170_p2 = pnand %p168_p1, %p165_p0 }
   0x7   :  { %173 = shalt.err (!%p170_p2)
}
   0x8   :  { %s174_s18 = scalar_lea.vmem %s15_s10, 256  ;;  %p179_p4 = scmp.lt.s32.totalorder %s15_s10, %s15_s10 }
   0x9   :  { %p175_p3 = scmp.ne.s32.totalorder %s15_s10, %s174_s18  ;;  %p180_p5 = scmp.lt.s32.totalorder %s174_s18, %s174_s18 }
   0xb   :  { %p181_p6 = por %p180_p5, %p179_p4 }
   0xd   :  { %p182_p7 = pnand %p181_p6, %p175_p3 }
   0xf   :  { %185 = shalt.err (!%p182_p7)
}
  0x10   :  { %s213_s19 = smov 32   ;;  %s214_s20 = smov 2  }
  0x11   :  { %20 = dma.hbm_to_vmem [thread:$0]  %s273_s0, 256, %s15_s10, [#allocation3], %s213_s19, %s213_s19, %s214_s20  }
  0x12   :  { %208 = dma.done.wait [#allocation3], 256  }
  0x13   :  { %209 = vsyncadd [#allocation3], 4294967040  ;;  %v40_v0 = vlaneseq  ;;  %v215_v1 = vmov 1966171168   ;;  %v34_v6 = vld [vmem:[%s274_s1] sm:$0xff]  ;;  %vm133_vm0 = vcmask 254976  }
  0x14   :  { %v38_v2 = vunpack.c.l.s4 %v215_v1  ;;  %v36_v9 = vcombine.high %v34_v6, %v34_v6  ;;  %v26_v13 = vld [vmem:[#allocation2] sm:$0x3]  ;;  %v27_v18 = vld [vmem:[#allocation2 + $0x2] sm:$0x3]  ;;  %v28_v19 = vld [vmem:[#allocation2 + $0x4] sm:$0x3] }
  0x15   :  { %v41_v3 = vshrl.u32 %v40_v0, 7  ;;  %v30_v25 = vld [vmem:[#allocation2 + $0x8] sm:$0x3]  ;;  %v29_v26 = vld [vmem:[#allocation2 + $0x6] sm:$0x3]  ;;  %s216_s0 = smov [#allocation5]  }
  0x16   :  { %v39_v4 = vunpack.c.0.s8 %v38_v2  ;;  %v31_v33 = vld [vmem:[#allocation2 + $0xa] sm:$0x3]  ;;  %v32_v34 = vld [vmem:[#allocation2 + $0xc] sm:$0x3]  ;;  %v33_v40 = vld [vmem:[#allocation2 + $0xe] sm:$0x3] }
  0x17   :  { %v87_v8 = vsub.s32 0, %v41_v3  ;;  %s147_s1 = sshll.u32 %s216_s0, 4  ;;  %s148_s1 = int_to_ptr.vmem [resolvable:$true] %s147_s1 }
  0x18   :  { %v42_v5 = vsub.s32 %v39_v4, %v41_v3  ;;  %s186_s25 = scalar_lea.vmem %s148_s1, 256  ;;  %p191_p9 = scmp.lt.s32.totalorder %s148_s1, %s148_s1 }
  0x19   :  { %p187_p8 = scmp.ne.s32.totalorder %s148_s1, %s186_s25  ;;  %p192_p10 = scmp.lt.s32.totalorder %s186_s25, %s186_s25 }
  0x1a   :  { %v43_v7 = vrot.slane %v34_v6, %v42_v5  ;;  %v50_v12 = vrot.slane %v36_v9, %v42_v5 }
  0x1b   :  { %p193_p11 = por %p192_p10, %p191_p9 }
  0x1c   :  { %v59_v10 = vrot.slane %v43_v7, %v42_v5  ;;  %v51_v11 = vcombine.high %v43_v7, %v43_v7  ;;  %v66_v17 = vrot.slane %v50_v12, %v42_v5  ;;  %v52_v20 = vcombine.high %v50_v12, %v50_v12 }
  0x1d   :  { %p194_p12 = pnand %p193_p11, %p187_p8 }
  0x1e   :  { %v88_v14 = vrot.slane %v59_v10, %v87_v8  ;;  %v73_v15 = vrot.slane %v51_v11, %v42_v5  ;;  %v81_v16 = vcombine.high %v59_v10, %v59_v10  ;;  %v104_v27 = vrot.slane %v66_v17, %v87_v8 }
  0x1f   :  { %v80_v28 = vrot.slane %v52_v20, %v42_v5  ;;  %v82_v29 = vcombine.high %v66_v17, %v66_v17 }
  0x20   :  { %v125_v21 = vadd.f32 %v88_v14, %v26_v13  ;;  %v92_v22 = vrot.slane %v73_v15, %v87_v8  ;;  %v96_v23 = vrot.slane %v81_v16, %v87_v8  ;;  %v83_v24 = vcombine.high %v73_v15, %v73_v15 }
  0x21   :  { %v129_v35 = vadd.f32 %v104_v27, %v30_v25  ;;  %v108_v36 = vrot.slane %v80_v28, %v87_v8  ;;  %v112_v37 = vrot.slane %v82_v29, %v87_v8  ;;  %v84_v38 = vcombine.high %v80_v28, %v80_v28 }
  0x22   :  { %134 = vst.msk [vmem:[#allocation5] sm:$0x3] %vm133_vm0, %v125_v21  ;;  %v126_v30 = vadd.f32 %v92_v22, %v27_v18  ;;  %v127_v31 = vadd.f32 %v96_v23, %v28_v19  ;;  %v100_v32 = vrot.slane %v83_v24, %v87_v8 }
  0x23   :  { %138 = vst.msk [vmem:[#allocation5 + $0x8] sm:$0x3] %vm133_vm0, %v129_v35  ;;  %v130_v41 = vadd.f32 %v108_v36, %v31_v33  ;;  %v131_v42 = vadd.f32 %v112_v37, %v32_v34  ;;  %v116_v43 = vrot.slane %v84_v38, %v87_v8 }
  0x24   :  { %135 = vst.msk [vmem:[#allocation5 + $0x2] sm:$0x3] %vm133_vm0, %v126_v30  ;;  %136 = vst.msk [vmem:[#allocation5 + $0x4] sm:$0x3] %vm133_vm0, %v127_v31  ;;  %v128_v39 = vadd.f32 %v100_v32, %v29_v26 }
  0x25   :  { %139 = vst.msk [vmem:[#allocation5 + $0xa] sm:$0x3] %vm133_vm0, %v130_v41  ;;  %140 = vst.msk [vmem:[#allocation5 + $0xc] sm:$0x3] %vm133_vm0, %v131_v42  ;;  %v132_v44 = vadd.f32 %v116_v43, %v33_v40 }
  0x26   :  { %137 = vst.msk [vmem:[#allocation5 + $0x6] sm:$0x3] %vm133_vm0, %v128_v39 }
  0x27   :  { %141 = vst.msk [vmem:[#allocation5 + $0xe] sm:$0x3] %vm133_vm0, %v132_v44 }
  0x28   :  { %197 = shalt.err (!%p194_p12)
}
  0x29   :  { %s198_s28 = scalar_lea.hbm %s275_s2, 256 }
  0x2a   :  { %p199_p13 = scmp.ne.s32.totalorder %s275_s2, %s198_s28  ;;  %p202_p0 = scmp.lt.u32.totalorder %s198_s28, %s275_s2 }
  0x2c   :  { %p204_p1 = pnand %p202_p0, %p199_p13 }
  0x2e   :  { %207 = shalt.err (!%p204_p1)
}
  0x2f   :  { %153 = dma.vmem_to_hbm [thread:$0]  %s148_s1, 256, %s275_s2, [#allocation4], %s213_s19, %s213_s19, %s214_s20  }
  0x30   :  { %210 = dma.done.wait [#allocation4], 256  }
  0x31   :  { %211 = vsyncadd [#allocation4], 4294967040 }
  0x32   :  { %157 = vsyncpa [#allocation3], 1 }
  0x33   :  { %158 = vsyncpa [#allocation4], 1 }

</bundles_post_ra>
